<compile_context>
chip_gen: v5e
topology: v5e:2x2
jax: 0.10.0
libtpu: 0.0.40
codegen_flags: <defaults>
</compile_context>

<pallas_src>
import functools

import jax
import jax.numpy as jnp
from jax.experimental import pallas as pl
from jax.experimental.pallas import tpu as pltpu


def _mlp_kernel(*refs, neg_slope, drop_p, training, h_chunk):
    use_dropout = training and drop_p > 0.0
    if use_dropout:
        x_ref, mask_ref, w1_ref, b1_ref, w2_ref, b2_ref, o_ref = refs
    else:
        x_ref, w1_ref, b1_ref, w2_ref, b2_ref, o_ref = refs
        mask_ref = None

    tm = x_ref.shape[0]
    H = w1_ref.shape[1]
    E_out = w2_ref.shape[1]
    n_chunks = H // h_chunk

    # MXU operands in the weight dtype (bf16 on the fast path); f32 accumulate.
    x = x_ref[...]
    if x.dtype != w1_ref.dtype:
        x = x.astype(w1_ref.dtype)

    acc = jnp.zeros((tm, E_out), jnp.float32)
    # Static (fully unrolled) loop over H chunks: keeps intermediates at
    # (tm, h_chunk) instead of (tm, H) and lets the scheduler overlap the VPU
    # elementwise work on chunk i with MXU work on neighbouring chunks.
    for c in range(n_chunks):
        lo = c * h_chunk
        hi = lo + h_chunk
        # ---- Linear 1 chunk: (tm, E) @ (E, hc) -----------------------------
        h = jnp.dot(x, w1_ref[:, lo:hi], preferred_element_type=jnp.float32)
        h = h + b1_ref[:, lo:hi].astype(jnp.float32)
        # ---- Dropout (PyTorch order: before the activation), f32 math ------
        if use_dropout:
            h = h * mask_ref[:, lo:hi]          # pre-scaled keep mask
        # ---- LeakyReLU (f32, VPU) -------------------------------------------
        h = jnp.where(h >= 0.0, h, neg_slope * h)
        # ---- Linear 2 chunk: (tm, hc) @ (hc, E), accumulate in f32 ----------
        acc = acc + jnp.dot(h.astype(w2_ref.dtype), w2_ref[lo:hi, :],
                            preferred_element_type=jnp.float32)

    acc = acc + b2_ref[...].astype(jnp.float32)
    o_ref[...] = acc.astype(o_ref.dtype)


def _round_up(n, m):
    return ((n + m - 1) // m) * m


def _default_row_tile(M):
    """Row tile: multiple of 8; >= 2 blocks when M allows (v7x has two
    TensorCores sharing the grid); capped at 512 rows to amortize the
    ~0.35 us per-grid-step overhead."""
    if M <= 8:
        return M                       # single full block (block == full dim)
    tm = min(512, _round_up(pl.cdiv(M, 2), 8))
    return min(tm, _round_up(M, 8))


def _pick_h_chunk(H):
    """H chunk for the in-kernel inner loop: a lane-aligned divisor of H in
    the 128..768 range, or H itself for small hidden sizes."""
    if H <= 768:
        return H
    for c in (768, 640, 512, 384, 256, 128):
        if H % c == 0:
            return c
    return H


def _dropout_mask(key, shape, drop_p):
    """Pre-scaled keep mask: 0 with prob drop_p, else 1/(1-drop_p) (f32)."""
    keep = jax.random.bernoulli(key, 1.0 - drop_p, shape)
    return keep.astype(jnp.float32) * (1.0 / (1.0 - drop_p))


def mlp_pallas(x, w1, b1, w2, b2, *, drop_p=0.2, neg_slope=0.01,
               training=False, dropout_key=None, tm=None, h_chunk=None):
    """Forward pass of _MLP: Linear(E,H) -> Dropout(p) -> LeakyReLU -> Linear(H,E).

    x: (..., E);  w1: (E, H);  b1: (H,);  w2: (H, E);  b2: (E,)
    Weights are stored pre-transposed (in, out) so the kernel computes x @ W,
    matching PyTorch's x @ W.T + b.  Pass the weights already in the dtype you
    want fed to the MXU (cast to bf16 ONCE at init for the fast path); the
    kernel casts activations to match and accumulates in f32, with all
    elementwise math in f32.  `dropout_key` is a jax PRNG key (runtime value,
    no recompiles when it changes) used only when training and drop_p > 0.
    """
    orig_shape = x.shape
    E = orig_shape[-1]
    H = w1.shape[1]
    x2d = x.reshape(-1, E)
    M = x2d.shape[0]

    use_dropout = training and drop_p > 0.0
    if training and not (0.0 <= drop_p < 1.0):
        raise ValueError(f"drop_p must be in [0, 1) when training, got {drop_p}")
    if use_dropout and dropout_key is None:
        raise ValueError("dropout_key is required when training with drop_p > 0")

    if tm is None:
        tm = _default_row_tile(M)
    if h_chunk is None:
        h_chunk = _pick_h_chunk(H)
    assert H % h_chunk == 0, (H, h_chunk)
    grid = (pl.cdiv(M, tm),)

    b1_2d = b1.reshape(1, H).astype(jnp.float32)
    b2_2d = b2.reshape(1, E).astype(jnp.float32)

    kernel = functools.partial(
        _mlp_kernel, neg_slope=neg_slope, drop_p=drop_p, training=training,
        h_chunk=h_chunk)

    # Grid-invariant operands: constant index_map => a single DMA across all
    # row tiles, and Buffered(1) => a single VMEM buffer (no wasted second
    # buffer for data that never changes).  Critical for v7x's 64 MiB VMEM.
    resident = functools.partial(pl.BlockSpec, pipeline_mode=pl.Buffered(1))

    in_specs = [pl.BlockSpec((tm, E), lambda i: (i, 0))]      # x row tile
    operands = [x2d]
    if use_dropout:
        mask = _dropout_mask(dropout_key, (M, H), drop_p)
        in_specs.append(pl.BlockSpec((tm, H), lambda i: (i, 0)))
        operands.append(mask)
    in_specs += [
        resident((E, H), lambda i: (0, 0)),    # W1 (resident, single buffer)
        resident((1, H), lambda i: (0, 0)),    # b1
        resident((H, E), lambda i: (0, 0)),    # W2 (resident, single buffer)
        resident((1, E), lambda i: (0, 0)),    # b2
    ]
    operands += [w1, b1_2d, w2, b2_2d]

    # Explicit VMEM budget: double-buffered x/out (and mask) tiles,
    # single-buffered weights/biases, chunked f32 intermediates + accumulator,
    # 2x headroom for Mosaic internal scratch; cap at 48 MiB so we never
    # request (nearly) all of v7x's 64 MiB physical VMEM.
    w_bytes = jnp.dtype(w1.dtype).itemsize
    x_bytes = jnp.dtype(x.dtype).itemsize
    est = (2 * 2 * tm * E * x_bytes                  # x + out, double-buffered
           + (2 * tm * H * 4 if use_dropout else 0)  # dropout mask tiles
           + (E * H + H * E) * w_bytes               # weights, single-buffered
           + (H + E) * 4                             # biases (f32)
           + 3 * tm * h_chunk * 4                    # f32 chunk intermediates
           + tm * E * 4)                             # f32 output accumulator
    vmem_limit = int(min(max(2 * est, 16 * 2 ** 20), 48 * 2 ** 20))

    # NOTE: with E < 128 the output tile is lane-sparse (masked stores); a
    # large tm amortizes this.  At real encoder sizes (E = 768) the output
    # rows are lane-dense.
    out2d = pl.pallas_call(
        kernel,
        out_shape=jax.ShapeDtypeStruct((M, E), x.dtype),
        grid_spec=pltpu.PrefetchScalarGridSpec(
            num_scalar_prefetch=0,
            grid=grid,
            in_specs=in_specs,
            out_specs=pl.BlockSpec((tm, E), lambda i: (i, 0)),
        ),
        compiler_params=pltpu.CompilerParams(
            dimension_semantics=("parallel",),
            vmem_limit_bytes=vmem_limit),
    )(*operands)

    return out2d.reshape(orig_shape)


# ----------------------------- references ----------------------------------

def _reference(x, w1, b1, w2, b2, neg_slope=0.01, mask=None):
    dot = functools.partial(jnp.dot, precision=jax.lax.Precision.HIGHEST)
    h = dot(x, w1) + b1
    if mask is not None:
        h = h * mask
    h = jnp.where(h >= 0.0, h, neg_slope * h)
    return dot(h, w2) + b2


def _reference_bf16(x, w1_bf16, b1, w2_bf16, b2, neg_slope=0.01, mask=None):
    """Emulates the kernel's bf16-operand / f32-accumulate path."""
    h = jnp.dot(x.astype(jnp.bfloat16), w1_bf16,
                preferred_element_type=jnp.float32) + b1
    if mask is not None:
        h = h * mask
    h = jnp.where(h >= 0.0, h, neg_slope * h)
    return jnp.dot(h.astype(jnp.bfloat16), w2_bf16,
                   preferred_element_type=jnp.float32) + b2


if __name__ == "__main__":
    # Small shapes consistent with the module: embed_dim=32, r=4, seq=8.
    batch, seq, embed_dim, r = 2, 8, 32, 4
    hidden = embed_dim * r

    key = jax.random.PRNGKey(0)
    kx, k1, k2, k3, k4, kd = jax.random.split(key, 6)

    x = jax.random.normal(kx, (batch, seq, embed_dim), dtype=jnp.float32)

    lim1 = 1.0 / (embed_dim ** 0.5)
    lim2 = 1.0 / (hidden ** 0.5)
    w1 = jax.random.uniform(k1, (embed_dim, hidden), jnp.float32, -lim1, lim1)
    b1 = jax.random.uniform(k2, (hidden,), jnp.float32, -lim1, lim1)
    w2 = jax.random.uniform(k3, (hidden, embed_dim), jnp.float32, -lim2, lim2)
    b2 = jax.random.uniform(k4, (embed_dim,), jnp.float32, -lim2, lim2)

    # bf16 copies of the weights, cast ONCE here (not per call) for the fast
    # MXU path, per the perf review.
    w1_bf16 = w1.astype(jnp.bfloat16)
    w2_bf16 = w2.astype(jnp.bfloat16)

    # 1) Eval mode, pure-f32 weights: Dropout is identity; matches the
    #    PyTorch module.
    out_f32 = jax.block_until_ready(
        mlp_pallas(x, w1, b1, w2, b2, drop_p=0.3, training=False))
    ref_f32 = _reference(x, w1, b1, w2, b2)
    assert out_f32.shape == x.shape
    assert jnp.allclose(out_f32, ref_f32, atol=2e-3, rtol=2e-3), \
        "f32 path mismatch vs reference"

    # 2) Eval mode, bf16-MXU fast path: compare against an f32 reference
    #    built from bf16-rounded operands.
    out_bf16 = jax.block_until_ready(
        mlp_pallas(x, w1_bf16, b1, w2_bf16, b2, drop_p=0.3, training=False))
    ref_bf16 = _reference_bf16(x, w1_bf16, b1, w2_bf16, b2)
    assert out_bf16.shape == x.shape
    assert jnp.allclose(out_bf16, ref_bf16, atol=2e-2, rtol=2e-2), \
        "bf16 path mismatch vs bf16-emulated reference"

    # 3) Training mode: the dropout mask comes from a runtime jax.random key
    #    (no recompiles across steps); verify against a reference that uses
    #    the exact same mask.
    drop_p = 0.3
    mask = _dropout_mask(kd, (batch * seq, hidden), drop_p)
    out_train = jax.block_until_ready(
        mlp_pallas(x, w1, b1, w2, b2, drop_p=drop_p, training=True,
                   dropout_key=kd))
    ref_train = _reference(x, w1, b1, w2, b2,
                           mask=mask.reshape(batch, seq, hidden))
    assert out_train.shape == x.shape
    assert bool(jnp.all(jnp.isfinite(out_train)))
    assert jnp.allclose(out_train, ref_train, atol=2e-3, rtol=2e-3), \
        "training (dropout) path mismatch vs same-mask reference"

    print("KERNEL_OK")
</pallas_src>

<mosaic_0001>
module attributes {stable_mosaic.version = 11 : i64} {
  func.func @_mlp_kernel(%arg0: i32, %arg1: memref<8x32xf32, #tpu.memory_space<vmem>>, %arg2: memref<32x128xf32, #tpu.memory_space<vmem>>, %arg3: memref<1x128xf32, #tpu.memory_space<vmem>>, %arg4: memref<128x32xf32, #tpu.memory_space<vmem>>, %arg5: memref<1x32xf32, #tpu.memory_space<vmem>>, %arg6: memref<8x32xf32, #tpu.memory_space<vmem>>) attributes {dimension_semantics = [#tpu.dimension_semantics<parallel>], iteration_bounds = array<i64: 2>, scalar_prefetch = 0 : i64, scratch_operands = 0 : i64, tpu.core_type = #tpu.core_type<tc>, window_params = [{transform_indices = @transform_0, window_bounds = array<i64: 8, 32>}, {pipeline_mode = #tpu.pipeline_mode<synchronous>, transform_indices = @transform_1, window_bounds = array<i64: 32, 128>}, {pipeline_mode = #tpu.pipeline_mode<synchronous>, transform_indices = @transform_2, window_bounds = array<i64: 1, 128>}, {pipeline_mode = #tpu.pipeline_mode<synchronous>, transform_indices = @transform_3, window_bounds = array<i64: 128, 32>}, {pipeline_mode = #tpu.pipeline_mode<synchronous>, transform_indices = @transform_4, window_bounds = array<i64: 1, 32>}, {transform_indices = @transform_5, window_bounds = array<i64: 8, 32>}]} {
    %c0 = arith.constant 0 : index
    %c0_0 = arith.constant 0 : index
    %0 = vector.load %arg1[%c0, %c0_0] : memref<8x32xf32, #tpu.memory_space<vmem>>, vector<8x32xf32>
    %cst = arith.constant 0.000000e+00 : f32
    %1 = vector.broadcast %cst : f32 to vector<8x32xf32>
    %c0_1 = arith.constant 0 : index
    %c0_2 = arith.constant 0 : index
    %2 = vector.load %arg2[%c0_1, %c0_2] : memref<32x128xf32, #tpu.memory_space<vmem>>, vector<32x128xf32>
    %cst_3 = arith.constant dense<0.000000e+00> : vector<8x128xf32>
    %3 = tpu.matmul %0, %2, %cst_3 {dimension_numbers = #tpu.dot_dimension_numbers<[1], [0], [0], [1], [0, 0, 1, 1], [], []>} : vector<8x32xf32>, vector<32x128xf32>, vector<8x128xf32> -> vector<8x128xf32>
    %c0_4 = arith.constant 0 : index
    %c0_5 = arith.constant 0 : index
    %4 = vector.load %arg3[%c0_4, %c0_5] : memref<1x128xf32, #tpu.memory_space<vmem>>, vector<1x128xf32>
    %5 = vector.broadcast %4 : vector<1x128xf32> to vector<8x128xf32>
    %6 = arith.addf %3, %5 : vector<8x128xf32>
    %cst_6 = arith.constant 0.000000e+00 : f32
    %7 = vector.broadcast %cst_6 : f32 to vector<8x128xf32>
    %8 = arith.cmpf oge, %6, %7 : vector<8x128xf32>
    %cst_7 = arith.constant 0.00999999977 : f32
    %9 = vector.broadcast %cst_7 : f32 to vector<8x128xf32>
    %10 = arith.mulf %9, %6 : vector<8x128xf32>
    %11 = arith.select %8, %6, %10 : vector<8x128xi1>, vector<8x128xf32>
    %c0_8 = arith.constant 0 : index
    %c0_9 = arith.constant 0 : index
    %12 = vector.load %arg4[%c0_8, %c0_9] : memref<128x32xf32, #tpu.memory_space<vmem>>, vector<128x32xf32>
    %cst_10 = arith.constant dense<0.000000e+00> : vector<8x32xf32>
    %13 = tpu.matmul %11, %12, %cst_10 {dimension_numbers = #tpu.dot_dimension_numbers<[1], [0], [0], [1], [0, 0, 1, 1], [], []>} : vector<8x128xf32>, vector<128x32xf32>, vector<8x32xf32> -> vector<8x32xf32>
    %14 = arith.addf %1, %13 : vector<8x32xf32>
    %c0_11 = arith.constant 0 : index
    %c0_12 = arith.constant 0 : index
    %15 = vector.load %arg5[%c0_11, %c0_12] : memref<1x32xf32, #tpu.memory_space<vmem>>, vector<1x32xf32>
    %16 = vector.broadcast %15 : vector<1x32xf32> to vector<8x32xf32>
    %17 = arith.addf %14, %16 : vector<8x32xf32>
    %c0_13 = arith.constant 0 : index
    %c0_14 = arith.constant 0 : index
    %18 = vector.load %arg6[%c0_13, %c0_14] : memref<8x32xf32, #tpu.memory_space<vmem>>, vector<8x32xf32>
    tpu.vector_store %arg6[%c0_13, %c0_14], %17 {strides = array<i32>} : memref<8x32xf32, #tpu.memory_space<vmem>>, vector<8x32xf32>,
    return
  }
  func.func @transform_0(%arg0: i32) -> (i32, i32) {
    %c0_i32 = arith.constant 0 : i32
    %c0_i32_0 = arith.constant 0 : i32
    return %arg0, %c0_i32 : i32, i32
  }
  func.func @transform_1(%arg0: i32) -> (i32, i32) {
    %c0_i32 = arith.constant 0 : i32
    %c0_i32_0 = arith.constant 0 : i32
    %c0_i32_1 = arith.constant 0 : i32
    return %c0_i32, %c0_i32_0 : i32, i32
  }
  func.func @transform_2(%arg0: i32) -> (i32, i32) {
    %c0_i32 = arith.constant 0 : i32
    %c0_i32_0 = arith.constant 0 : i32
    %c0_i32_1 = arith.constant 0 : i32
    return %c0_i32, %c0_i32_0 : i32, i32
  }
  func.func @transform_3(%arg0: i32) -> (i32, i32) {
    %c0_i32 = arith.constant 0 : i32
    %c0_i32_0 = arith.constant 0 : i32
    %c0_i32_1 = arith.constant 0 : i32
    return %c0_i32, %c0_i32_0 : i32, i32
  }
  func.func @transform_4(%arg0: i32) -> (i32, i32) {
    %c0_i32 = arith.constant 0 : i32
    %c0_i32_0 = arith.constant 0 : i32
    %c0_i32_1 = arith.constant 0 : i32
    return %c0_i32, %c0_i32_0 : i32, i32
  }
  func.func @transform_5(%arg0: i32) -> (i32, i32) {
    %c0_i32 = arith.constant 0 : i32
    %c0_i32_0 = arith.constant 0 : i32
    return %arg0, %c0_i32 : i32, i32
  }
}

</mosaic_0001>

<bundles_post_ra>
// kernel: tpu_custom_call.1
= control target key start
LH: loop header
LB: loop body
LE: loop exit
PB: predicated region body
PF: predicated region fallthrough
CT: control target
= control target key end

     0   :  { %10 = vsyncpa [#allocation3], 0  ;;  %s671_s0 = inlined_call_operand.vmem [shape: f32[16,32], index: 0, kind: input, shape index: {}]   ;;  %s672_s1 = inlined_call_operand.vmem [shape: f32[32,128], index: 1, kind: input, shape index: {}]   ;;  %s673_s2 = inlined_call_operand.vmem [shape: f32[1,128], index: 2, kind: input, shape index: {}]   ;;  %s674_s3 = inlined_call_operand.vmem [shape: f32[128,32], index: 3, kind: input, shape index: {}]   ;;  %s675_s4 = inlined_call_operand.vmem [shape: f32[1,32], index: 4, kind: input, shape index: {}]   ;;  %s676_s5 = inlined_call_operand.hbm [shape: f32[16,32], index: 5, kind: output, shape index: {}]  }
   0x1   :  { %12 = vsyncpa [#allocation3 + $0x1], 0  ;;  %s518_s18 = smov 0   ;;  %s520_s19 = smov 0  }
   0x2   :  { %s522_s20 = smov 0   ;;  %s524_s21 = smov 0  }
   0x3 LB: > { %s539_s22 = sadd.s32 4294967295, %s486_s21   ;;  %s372_s23 = sadd.s32 4294967294, %s486_s21   ;;  %s486_s21 = sphi %s524_s21, %s682_s21   ;;  %s482_s20 = sphi %s522_s20, %s681_s20   ;;  %s478_s19 = sphi %s520_s19, %s680_s19   ;;  %s474_s18 = sphi %s518_s18, %s679_s18  }
   0x4   : > { %s543_s24 = sadd.s32 1, %s486_s21   ;;  %s135_s25 = sadd.s32 1, %s482_s20 }
   0x5   : > { %s132_s26 = ssub.s32 %s486_s21, %s543_s24  ;;  %p145_p0 = scmp.ne.s32.totalorder %s482_s20, %s478_s19 }
   0x6   : > { %p133_p1 = scmp.eq.s32.totalorder %s132_s26, 0  ;;  %p146_p2 = scmp.eq.s32.totalorder %s539_s22, 1 }
   0x7   : > { %p151_p3 = scmp.ne.s32.totalorder %s478_s19, %s474_s18  ;;  %p152_p4 = scmp.eq.s32.totalorder %s372_s23, 1 }
   0x8   : > { %s554_s27 = scalar_select %p133_p1, %s482_s20, %s135_s25  }
   0x9   : > { %p556_p5 = por %p146_p2, %p145_p0  ;;  %p560_p6 = por %p152_p4, %p151_p3 }
   0xa   : > { %p375_p7 = scmp.ge.s32.totalorder %s486_s21, 1  ;;  %p189_p8 = scmp.lt.s32.totalorder %s486_s21, 3 }
   0xc   : > { %p190_p9 = pnand %p375_p7, %p189_p8 }
   0xd   : > { %p216_p10 = scmp.lt.s32.totalorder (!%p190_p9), %s539_s22, 1  ;;  %s380_s6 = sshll.u32 (!%p190_p9), %s539_s22, 3 }
   0xe   : > { %193 = sbr.rel (%p190_p9) target bundleno = 289 (0x121), region = 40  ;;  %s308_s9 = scalar_lea.hbm (!%p190_p9), %s676_s5, %s380_s6 }
   0xf   : > { %s312_s14 = sshll.u32 (!%p190_p9), %s308_s9, 4  ;;  %s444_s25 = scalar_lea.hbm (!%p190_p9), %s676_s5, 16  ;;  %s313_s14 = int_to_ptr.hbm [resolvable:$true] %s312_s14 }
  0x13   : > { %v224_v0 = vld [vmem:[%s672_s1 + $0x18] sm:$0xff]  ;;  %v223_v1 = vld [vmem:[%s672_s1 + $0x10] sm:$0xff]  ;;  %v222_v4 = vld [vmem:[%s672_s1 + $0x8] sm:$0xff]  ;;  %s217_s15 = scalar_select %p216_p10, %s539_s22, 1  ;;  %vm229_vm0 = vcmask 261120  }
  0x14   : > { %245 = vmatpush.msra.mxu0 %v224_v0  ;;  %v271_v2 = vld [vmem:[%s674_s3 + $0x78] sm:$0xff]  ;;  %v270_v3 = vld [vmem:[%s674_s3 + $0x70] sm:$0xff]  ;;  %v269_v5 = vld [vmem:[%s674_s3 + $0x68] sm:$0xff]  ;;  %s438_s22 = sshra.s32 %s313_s14, 4  ;;  %s439_s22 = int_to_ptr.hbm [resolvable:$true] %s438_s22 }
  0x15   : > { %276 = vmatpush.msra.mxu1 %v271_v2  ;;  %v221_v6 = vld [vmem:[%s672_s1] sm:$0xff]  ;;  %s377_s26 = sshll.u32 %s217_s15, 3  ;;  %v267_v9 = vld [vmem:[%s674_s3 + $0x58] sm:$0xff]  ;;  %v266_v10 = vld [vmem:[%s674_s3 + $0x50] sm:$0xff]  ;;  %s440_s16 = scalar_lea.hbm %s439_s22, 8 }
  0x16   : > { %246 = vmatpush.msra.mxu0 %v223_v1  ;;  %s219_s7 = scalar_lea.vmem %s671_s0, %s377_s26  ;;  %v268_v7 = vld [vmem:[%s674_s3 + $0x60] sm:$0xff]  ;;  %v265_v11 = vld [vmem:[%s674_s3 + $0x48] sm:$0xff]  ;;  %v263_v13 = vld [vmem:[%s674_s3 + $0x38] sm:$0xff]  ;;  %s213_s26 = sand.u32 1, %s478_s19  }
  0x17   : > { %277 = vmatpush.msra.mxu1 %v270_v3  ;;  %v220_v8 = vld [vmem:[%s219_s7] sm:$0xff]  ;;  %v262_v14 = vld [vmem:[%s674_s3 + $0x30] sm:$0xff]  ;;  %v261_v15 = vld [vmem:[%s674_s3 + $0x28] sm:$0xff]  ;;  %s376_s30 = sshll.u32 %s213_s26, 3  ;;  %s298_s15 = scalar_lea.sflag [#allocation3], %s213_s26 }
  0x18   : > { %247 = vmatpush.msra.mxu0 %v222_v4  ;;  %v264_v12 = vld [vmem:[%s674_s3 + $0x40] sm:$0xff]  ;;  %v259_v17 = vld [vmem:[%s674_s3 + $0x18] sm:$0xff]  ;;  %v258_v18 = vld [vmem:[%s674_s3 + $0x10] sm:$0xff]  ;;  %s215_s12 = scalar_lea.vmem [#allocation2], %s376_s30  ;;  %p441_p11 = scmp.ne.s32.totalorder %s439_s22, %s440_s16 }
  0x19   : > { %278 = vmatpush.msra.mxu1 %v269_v5  ;;  %v260_v16 = vld [vmem:[%s674_s3 + $0x20] sm:$0xff]  ;;  %v257_v19 = vld [vmem:[%s674_s3 + $0x8] sm:$0xff]  ;;  %s310_s13 = sshll.u32 %s215_s12, 4  ;;  %p445_p0 = scmp.lt.s32.totalorder %s439_s22, %s676_s5  ;;  %s311_s13 = int_to_ptr.vmem [resolvable:$true] %s310_s13 }
  0x1a   : > { %248 = vmatpush.msra.mxu0 %v221_v6  ;;  %v256_v20 = vld [vmem:[%s674_s3] sm:$0xff]  ;;  %p442_p12 = pnand %p441_p11, %p556_p5  ;;  %p446_p1 = scmp.lt.s32.totalorder %s444_s25, %s440_s16 }
  0x1b   : > { %378 = vmatmul.msk.f32.vlgmr.msra.gmra.mxu0 %vm229_vm0, %v220_v8  ;;  %279 = vmatpush.msra.mxu1 %v268_v7  ;;  %v422_v21 = vld [vmem:[%s673_s2] ss:$0 sm:$0xff] }
  0x1c   : > { %v423_v26 = vld [vmem:[%s675_s4] ss:$0 sm:$0xff]  ;;  %p443_p13 = pneg %p442_p12  ;;  %p447_p2 = por %p446_p1, %p445_p0 }
  0x1d   : > { %280 = vmatpush.msra.mxu1 %v267_v9 }
  0x1e   : > { %p448_p3 = pnand %p447_p2, %p443_p13 }
  0x1f   : > { %281 = vmatpush.msra.mxu1 %v266_v10 }
  0x21   : > { %282 = vmatpush.msra.mxu1 %v265_v11 }
  0x23   : > { %283 = vmatpush.msra.mxu1 %v264_v12 }
  0x25   : > { %284 = vmatpush.msra.mxu1 %v263_v13 }
  0x27   : > { %285 = vmatpush.msra.mxu1 %v262_v14 }
  0x29   : > { %286 = vmatpush.msra.mxu1 %v261_v15 }
  0x2b   : > { %287 = vmatpush.msra.mxu1 %v260_v16 }
  0x2d   : > { %288 = vmatpush.msra.mxu1 %v259_v17 }
  0x2f   : > { %289 = vmatpush.msra.mxu1 %v258_v18 }
  0x31   : > { %290 = vmatpush.msra.mxu1 %v257_v19 }
  0x33   : > { %291 = vmatpush.msra.mxu1 %v256_v20 }
  0x98   : > { %v250_v22 = vpop.f32.mrf.mxu0 }
  0x99   : > { %v251_v23 = vadd.f32 %v422_v21, %v250_v22 }
  0x9b   : > { %vm253_vm1 = vcmp.ge.f32.partialorder %v251_v23, 0.0  ;;  %v254_v24 = vmul.f32 0.01, %v251_v23 }
  0x9d   : > { %v255_v25 = vsel %vm253_vm1, %v251_v23, %v254_v24 }
  0x9e   : > { %292 = vmatmul.f32.vlgmr.msra.gmra.mxu1 %v255_v25 }
 0x11b   : > { %v293_v27 = vpop.f32.mrf.mxu1 }
 0x11c   : > { %v294_v28 = vadd.f32 %v423_v26, %v293_v27 }
 0x11e   : > { %296 = vst.msk [vmem:[%s215_s12] sm:$0xff] %vm229_vm0, %v294_v28 }
 0x11f   : > { %451 = shalt.err (!%p448_p3)
}
 0x120   : > { %383 = dma.vmem_to_hbm [thread:$0]  (%p556_p5), %s311_s13, 128, %s313_s14, %s298_s15  }
 0x121 PF: > { %p389_p4 = scmp.ge.s32.totalorder %s486_s21, 2  ;;  %s324_s26 = sand.u32 1, %s474_s18  }
 0x122   : > { %s325_s7 = scalar_lea.sflag [#allocation3], %s324_s26 }
 0x123   : > { %p386_p7 = pnand %p389_p4, %p560_p6 }
 0x125   : > { %p387_p8 = pneg %p386_p7 }
 0x127   : > { %469 = dma.done.wait (%p387_p8), %s325_s7, 128  }
 0x128   : > { %471 = vsyncadd (%p387_p8), %s325_s7, 4294967168  ;;  %p15_p9 = scmp.ge.s32.totalorder %s543_s24, 4   ;;  %s679_s18 = smov %s478_s19 }
 0x129   : > { %s680_s19 = smov %s482_s20  ;;  %s681_s20 = smov %s554_s27 }
 0x12a   : > { %s682_s21 = smov %s543_s24  ;;  %17 = sbr.rel (!%p15_p9) target bundleno = 3 (0x3), region = 75 }
 0x12f   :  { %331 = vsyncpa [#allocation3], 1 }
 0x130   :  { %333 = vsyncpa [#allocation3 + $0x1], 1 }

</bundles_post_ra>
